<compile_context>
chip_gen: v7x
topology: tpu7x:2x2x1
jax: 0.10.0
libtpu: 0.0.40
codegen_flags: <defaults>
</compile_context>

<pallas_src>
import functools

import numpy as np
import jax
import jax.numpy as jnp
from jax.experimental import pallas as pl
from jax.experimental.pallas import tpu as pltpu

N = 5  # number of soft-thresholdings (module default)

_LANE_CANDIDATES = (8192, 4096, 2048, 1024, 512, 256, 128)
_TARGET_BLOCK_BYTES = 4 * 1024 * 1024   # ~4 MiB blocks sit at the HBM-roofline knee
_MIN_SPLIT_BYTES = 512 * 1024           # above this, force >=2 grid steps (v7x dual-TC)
_SUBLANE = {4: 8, 2: 16, 1: 32}         # native sublane tile per element size


def _mst_kernel(params_ref, x_ref, o_ref, *, n):
    # params_ref: SMEM (1+3n,) f32 = [sum(a)/sum|a|, a_i/sum|a| (n), lo_i (n), hi_i (n)]
    # x_ref / o_ref: VMEM (block_rows, lane) tiles.
    x = x_ref[...].astype(jnp.float32)
    acc = x * params_ref[0]
    for i in range(n):  # n small & static -> unrolled
        a = params_ref[1 + i]
        lo = params_ref[1 + n + i]
        hi = params_ref[1 + 2 * n + i]
        acc = acc - a * jnp.minimum(jnp.maximum(x, lo), hi)
    o_ref[...] = acc.astype(o_ref.dtype)


def _folded_params(alphas, betas, cetas):
    """Hoist all scalar math: clamp, normalization, and the cetas fold into clip bounds."""
    a32 = alphas.astype(jnp.float32).reshape(-1)
    b32 = jnp.maximum(betas.astype(jnp.float32).reshape(-1), 0.0)  # betas.clamp_(0)
    c32 = cetas.astype(jnp.float32).reshape(-1)
    inv = 1.0 / jnp.sum(jnp.abs(a32))   # inf/nan if sum|a|==0, exactly like the reference
    a_n = a32 * inv                     # a_i / sum|a|
    sum_a_n = jnp.sum(a32) * inv        # sum(a) / sum|a|
    lo = -b32 - c32
    hi = b32 - c32
    params = jnp.concatenate([sum_a_n[None], a_n, lo, hi])  # single packed SMEM operand
    return params, sum_a_n, a_n, lo, hi


def _folded_jnp_apply(x, sum_a_n, a_n, lo, hi):
    """Plain-jnp version of the folded formula (tiny remainders / sub-128 tensors)."""
    x32 = x.astype(jnp.float32)
    acc = x32 * sum_a_n
    for i in range(a_n.shape[0]):
        acc = acc - a_n[i] * jnp.clip(x32, lo[i], hi[i])
    return acc.astype(x.dtype)


def _run_pallas(x2d, params, n):
    rows, lane = x2d.shape
    itemsize = x2d.dtype.itemsize
    sublane = _SUBLANE.get(itemsize, 8)

    # Dtype-aware block sizing, rounded to the native sublane tile.
    target_rows = max(sublane,
                      (_TARGET_BLOCK_BYTES // (itemsize * lane) // sublane) * sublane)
    total_bytes = rows * lane * itemsize
    if rows > target_rows:
        block_rows = target_rows
    elif rows >= 2 * sublane and total_bytes >= _MIN_SPLIT_BYTES:
        # Fits in one block, but split so a "parallel" grid actually feeds both v7x TCs.
        half = (rows + 1) // 2
        block_rows = min(rows, ((half + sublane - 1) // sublane) * sublane)
    else:
        block_rows = rows  # full extent: always a legal block shape
    grid_steps = (rows + block_rows - 1) // block_rows

    # Deeper input buffering only helps once there are enough steps to hide DMA latency.
    x_spec_kwargs = {}
    in_bufs = 2
    if grid_steps >= 3:
        in_bufs = 3
        x_spec_kwargs["pipeline_mode"] = pl.Buffered(3)

    block_bytes = block_rows * lane * itemsize
    # (in + out buffers) * block, with 2x headroom; floor 16 MiB, cap under v7x physical.
    vmem_limit = int(min(56 * 1024 * 1024,
                         max(16 * 1024 * 1024, 2 * (in_bufs + 2) * block_bytes)))

    return pl.pallas_call(
        functools.partial(_mst_kernel, n=n),
        out_shape=jax.ShapeDtypeStruct(x2d.shape, x2d.dtype),
        grid_spec=pltpu.PrefetchScalarGridSpec(
            num_scalar_prefetch=0,
            grid=(grid_steps,),
            in_specs=[
                pl.BlockSpec(memory_space=pltpu.MemorySpace.SMEM),   # packed params (1+3n,)
                pl.BlockSpec((block_rows, lane), lambda i: (i, 0), **x_spec_kwargs),
            ],
            out_specs=pl.BlockSpec((block_rows, lane), lambda i: (i, 0)),
        ),
        compiler_params=pltpu.CompilerParams(
            dimension_semantics=("parallel",),
            vmem_limit_bytes=vmem_limit),
    )(params, x2d)


def multi_soft_thresholding(x, alphas, betas, cetas):
    """x: any shape (e.g. NCHW). alphas/betas/cetas: (N,) float32 parameters."""
    # TODO(synk): the PyTorch module mutates betas in place (betas.data.clamp_(0));
    # we only use the clamped values for the forward and do not write back to the params.
    orig_shape = x.shape
    n_elem = int(np.prod(orig_shape)) if orig_shape else 1

    params, sum_a_n, a_n, lo, hi = _folded_params(alphas, betas, cetas)
    n = int(a_n.shape[0])

    flat = x.reshape(-1)

    # Lane-dense 2-D view: widest lane width (multiple of 128) that divides n_elem.
    lane = next((w for w in _LANE_CANDIDATES if n_elem >= w and n_elem % w == 0), None)
    if lane is not None:
        out2d = _run_pallas(flat.reshape(-1, lane), params, n)
        return out2d.reshape(orig_shape)

    # Element count not a multiple of 128: kernel on the 128-aligned bulk, plain jnp on
    # the <128-element remainder (avoids a full-tensor pad + slice round trip).
    bulk = (n_elem // 128) * 128
    if bulk == 0:
        return _folded_jnp_apply(flat, sum_a_n, a_n, lo, hi).reshape(orig_shape)
    lane = next(w for w in _LANE_CANDIDATES if bulk % w == 0)
    out_bulk = _run_pallas(flat[:bulk].reshape(-1, lane), params, n)
    out_rem = _folded_jnp_apply(flat[bulk:], sum_a_n, a_n, lo, hi)
    return jnp.concatenate([out_bulk.reshape(-1), out_rem]).reshape(orig_shape)


def _reference(x, alphas, betas, cetas):
    # Plain-JAX reference mirroring the PyTorch forward term-by-term.
    x = x.astype(jnp.float32)
    a = alphas.astype(jnp.float32)
    b = jnp.maximum(betas.astype(jnp.float32), 0.0)
    c = cetas.astype(jnp.float32)

    def st(xs, ai, bi):
        return ai * jax.nn.relu(xs - bi) - ai * jax.nn.relu(-xs - bi)

    y = st(x + c[0], a[0], b[0])
    for i in range(1, a.shape[0]):
        y = y + st(x + c[i], a[i], b[i])
    return y / jnp.sum(jnp.abs(a))


if __name__ == "__main__":
    key = jax.random.PRNGKey(0)
    kx, ka, kb, kc, k2, k3, k4 = jax.random.split(key, 7)

    # Deterministic "torch.randn(1)"-style scalar parameters, one per soft-thresholding.
    alphas = jax.random.normal(ka, (N,), dtype=jnp.float32)
    betas = jax.random.normal(kb, (N,), dtype=jnp.float32)
    cetas = jax.random.normal(kc, (N,), dtype=jnp.float32)

    # Primary small NCHW input (single-block path).
    x = jax.random.normal(kx, (2, 4, 16, 16), dtype=jnp.float32)
    out = jax.block_until_ready(multi_soft_thresholding(x, alphas, betas, cetas))
    np.testing.assert_allclose(np.asarray(out),
                               np.asarray(_reference(x, alphas, betas, cetas)),
                               rtol=1e-5, atol=1e-5)

    # Mid-size: fits one block, but is split so both v7x TensorCores get a grid step.
    x_mid = jax.random.normal(k2, (4, 8, 128, 128), dtype=jnp.float32)
    out_mid = jax.block_until_ready(multi_soft_thresholding(x_mid, alphas, betas, cetas))
    np.testing.assert_allclose(np.asarray(out_mid),
                               np.asarray(_reference(x_mid, alphas, betas, cetas)),
                               rtol=1e-5, atol=1e-5)

    # Multi-block grid (>=3 steps -> Buffered(3) input) with a ragged masked tail block.
    x_big = jax.random.normal(k3, (2, 4, 328, 1024), dtype=jnp.float32)
    out_big = jax.block_until_ready(multi_soft_thresholding(x_big, alphas, betas, cetas))
    np.testing.assert_allclose(np.asarray(out_big),
                               np.asarray(_reference(x_big, alphas, betas, cetas)),
                               rtol=1e-5, atol=1e-5)

    # Element count not divisible by 128: kernel on the bulk + jnp remainder.
    x_odd = jax.random.normal(k4, (3, 5, 7, 11), dtype=jnp.float32)
    out_odd = jax.block_until_ready(multi_soft_thresholding(x_odd, alphas, betas, cetas))
    np.testing.assert_allclose(np.asarray(out_odd),
                               np.asarray(_reference(x_odd, alphas, betas, cetas)),
                               rtol=1e-5, atol=1e-5)

    # bf16 path: dtype-aware (16,128)-tile block sizing.
    x_bf = jax.random.normal(k2, (4, 8, 128, 128), dtype=jnp.float32).astype(jnp.bfloat16)
    out_bf = jax.block_until_ready(multi_soft_thresholding(x_bf, alphas, betas, cetas))
    ref_bf = _reference(x_bf.astype(jnp.float32), alphas, betas, cetas)
    np.testing.assert_allclose(np.asarray(out_bf, dtype=np.float32), np.asarray(ref_bf),
                               rtol=2e-2, atol=2e-2)

    print("KERNEL_OK")
</pallas_src>

<mosaic_0001>
module attributes {stable_mosaic.version = 11 : i64} {
  func.func @_mst_kernel(%arg0: i32, %arg1: memref<16xf32, #tpu.memory_space<smem>>, %arg2: memref<1x2048xf32, #tpu.memory_space<vmem>>, %arg3: memref<1x2048xf32, #tpu.memory_space<vmem>>) attributes {dimension_semantics = [#tpu.dimension_semantics<parallel>], iteration_bounds = array<i64: 1>, scalar_prefetch = 0 : i64, scratch_operands = 0 : i64, tpu.core_type = #tpu.core_type<tc>, window_params = [{transform_indices = @transform_0, window_bounds = array<i64: 16>}, {transform_indices = @transform_1, window_bounds = array<i64: 1, 2048>}, {transform_indices = @transform_2, window_bounds = array<i64: 1, 2048>}]} {
    %c0 = arith.constant 0 : index
    %c0_0 = arith.constant 0 : index
    %0 = vector.load %arg2[%c0, %c0_0] : memref<1x2048xf32, #tpu.memory_space<vmem>>, vector<1x2048xf32>
    %c0_1 = arith.constant 0 : index
    %1 = memref.load %arg1[%c0_1] : memref<16xf32, #tpu.memory_space<smem>>
    %2 = vector.broadcast %1 : f32 to vector<1x2048xf32>
    %3 = arith.mulf %0, %2 : vector<1x2048xf32>
    %c1 = arith.constant 1 : index
    %4 = memref.load %arg1[%c1] : memref<16xf32, #tpu.memory_space<smem>>
    %c6 = arith.constant 6 : index
    %5 = memref.load %arg1[%c6] : memref<16xf32, #tpu.memory_space<smem>>
    %c11 = arith.constant 11 : index
    %6 = memref.load %arg1[%c11] : memref<16xf32, #tpu.memory_space<smem>>
    %7 = vector.broadcast %5 : f32 to vector<1x2048xf32>
    %8 = arith.maximumf %0, %7 : vector<1x2048xf32>
    %9 = vector.broadcast %6 : f32 to vector<1x2048xf32>
    %10 = arith.minimumf %8, %9 : vector<1x2048xf32>
    %11 = vector.broadcast %4 : f32 to vector<1x2048xf32>
    %12 = arith.mulf %11, %10 : vector<1x2048xf32>
    %13 = arith.subf %3, %12 : vector<1x2048xf32>
    %c2 = arith.constant 2 : index
    %14 = memref.load %arg1[%c2] : memref<16xf32, #tpu.memory_space<smem>>
    %c7 = arith.constant 7 : index
    %15 = memref.load %arg1[%c7] : memref<16xf32, #tpu.memory_space<smem>>
    %c12 = arith.constant 12 : index
    %16 = memref.load %arg1[%c12] : memref<16xf32, #tpu.memory_space<smem>>
    %17 = vector.broadcast %15 : f32 to vector<1x2048xf32>
    %18 = arith.maximumf %0, %17 : vector<1x2048xf32>
    %19 = vector.broadcast %16 : f32 to vector<1x2048xf32>
    %20 = arith.minimumf %18, %19 : vector<1x2048xf32>
    %21 = vector.broadcast %14 : f32 to vector<1x2048xf32>
    %22 = arith.mulf %21, %20 : vector<1x2048xf32>
    %23 = arith.subf %13, %22 : vector<1x2048xf32>
    %c3 = arith.constant 3 : index
    %24 = memref.load %arg1[%c3] : memref<16xf32, #tpu.memory_space<smem>>
    %c8 = arith.constant 8 : index
    %25 = memref.load %arg1[%c8] : memref<16xf32, #tpu.memory_space<smem>>
    %c13 = arith.constant 13 : index
    %26 = memref.load %arg1[%c13] : memref<16xf32, #tpu.memory_space<smem>>
    %27 = vector.broadcast %25 : f32 to vector<1x2048xf32>
    %28 = arith.maximumf %0, %27 : vector<1x2048xf32>
    %29 = vector.broadcast %26 : f32 to vector<1x2048xf32>
    %30 = arith.minimumf %28, %29 : vector<1x2048xf32>
    %31 = vector.broadcast %24 : f32 to vector<1x2048xf32>
    %32 = arith.mulf %31, %30 : vector<1x2048xf32>
    %33 = arith.subf %23, %32 : vector<1x2048xf32>
    %c4 = arith.constant 4 : index
    %34 = memref.load %arg1[%c4] : memref<16xf32, #tpu.memory_space<smem>>
    %c9 = arith.constant 9 : index
    %35 = memref.load %arg1[%c9] : memref<16xf32, #tpu.memory_space<smem>>
    %c14 = arith.constant 14 : index
    %36 = memref.load %arg1[%c14] : memref<16xf32, #tpu.memory_space<smem>>
    %37 = vector.broadcast %35 : f32 to vector<1x2048xf32>
    %38 = arith.maximumf %0, %37 : vector<1x2048xf32>
    %39 = vector.broadcast %36 : f32 to vector<1x2048xf32>
    %40 = arith.minimumf %38, %39 : vector<1x2048xf32>
    %41 = vector.broadcast %34 : f32 to vector<1x2048xf32>
    %42 = arith.mulf %41, %40 : vector<1x2048xf32>
    %43 = arith.subf %33, %42 : vector<1x2048xf32>
    %c5 = arith.constant 5 : index
    %44 = memref.load %arg1[%c5] : memref<16xf32, #tpu.memory_space<smem>>
    %c10 = arith.constant 10 : index
    %45 = memref.load %arg1[%c10] : memref<16xf32, #tpu.memory_space<smem>>
    %c15 = arith.constant 15 : index
    %46 = memref.load %arg1[%c15] : memref<16xf32, #tpu.memory_space<smem>>
    %47 = vector.broadcast %45 : f32 to vector<1x2048xf32>
    %48 = arith.maximumf %0, %47 : vector<1x2048xf32>
    %49 = vector.broadcast %46 : f32 to vector<1x2048xf32>
    %50 = arith.minimumf %48, %49 : vector<1x2048xf32>
    %51 = vector.broadcast %44 : f32 to vector<1x2048xf32>
    %52 = arith.mulf %51, %50 : vector<1x2048xf32>
    %53 = arith.subf %43, %52 : vector<1x2048xf32>
    %c0_2 = arith.constant 0 : index
    %c0_3 = arith.constant 0 : index
    %54 = vector.load %arg3[%c0_2, %c0_3] : memref<1x2048xf32, #tpu.memory_space<vmem>>, vector<1x2048xf32>
    tpu.vector_store %arg3[%c0_2, %c0_3], %53 {strides = array<i32>} : memref<1x2048xf32, #tpu.memory_space<vmem>>, vector<1x2048xf32>,
    return
  }
  func.func @transform_0(%arg0: i32) -> i32 {
    %c0_i32 = arith.constant 0 : i32
    %c0_i32_0 = arith.constant 0 : i32
    return %c0_i32 : i32
  }
  func.func @transform_1(%arg0: i32) -> (i32, i32) {
    %c0_i32 = arith.constant 0 : i32
    %c0_i32_0 = arith.constant 0 : i32
    return %arg0, %c0_i32 : i32, i32
  }
  func.func @transform_2(%arg0: i32) -> (i32, i32) {
    %c0_i32 = arith.constant 0 : i32
    %c0_i32_0 = arith.constant 0 : i32
    return %arg0, %c0_i32 : i32, i32
  }
}

</mosaic_0001>

<bundles_post_ra>
// kernel: tpu_custom_call.1
= control target key start
LH: loop header
LB: loop body
LE: loop exit
PB: predicated region body
PF: predicated region fallthrough
CT: control target
= control target key end

     0   :  { %7 = vsyncpa [#allocation5], 0  ;;  %s300_s0 = inlined_call_operand.hbm [shape: f32[16], index: 0, kind: input, shape index: {}]   ;;  %s301_s1 = inlined_call_operand.hbm [shape: f32[1,2048], index: 1, kind: input, shape index: {}]   ;;  %s302_s2 = inlined_call_operand.hbm [shape: f32[1,2048], index: 2, kind: output, shape index: {}]  }
   0x1   :  { %8 = vsyncpa [#allocation3], 0 }
   0x2   :  { %9 = vsyncpa [#allocation4], 0  ;;  %s147_s11 = scalar_lea.hbm %s300_s0, 16 }
   0x3   :  { %p148_p0 = scmp.ne.s32.totalorder %s300_s0, %s147_s11  ;;  %p151_p1 = scmp.lt.u32.totalorder %s147_s11, %s300_s0 }
   0x5   :  { %p153_p2 = pnand %p151_p1, %p148_p0 }
   0x7   :  { %156 = shalt.err (!%p153_p2)
}
   0x8   :  { %s207_s16 = smov [#allocation2]   ;;  %s208_s19 = smov [#allocation6]  }
   0x9   :  { %17 = dma.hbm_to_smem %s300_s0, 16, %s207_s16, [#allocation5]  }
   0xa   :  { %s24_s20 = sshll.u32 %s208_s19, 4  ;;  %s157_s23 = scalar_lea.hbm %s301_s1, 256  ;;  %s25_s20 = int_to_ptr.vmem [resolvable:$true] %s24_s20 }
   0xb   :  { %p158_p3 = scmp.ne.s32.totalorder %s301_s1, %s157_s23  ;;  %p161_p4 = scmp.lt.u32.totalorder %s157_s23, %s301_s1 }
   0xd   :  { %p163_p5 = pnand %p161_p4, %p158_p3 }
   0xf   :  { %166 = shalt.err (!%p163_p5)
}
  0x10   :  { %s167_s28 = scalar_lea.vmem %s25_s20, 256  ;;  %p172_p7 = scmp.lt.s32.totalorder %s25_s20, %s25_s20 }
  0x11   :  { %p168_p6 = scmp.ne.s32.totalorder %s25_s20, %s167_s28  ;;  %p173_p8 = scmp.lt.s32.totalorder %s167_s28, %s167_s28 }
  0x13   :  { %p174_p9 = por %p173_p8, %p172_p7 }
  0x15   :  { %p175_p10 = pnand %p174_p9, %p168_p6 }
  0x17   :  { %178 = shalt.err (!%p175_p10)
}
  0x18   :  { %27 = dma.hbm_to_vmem [thread:$0]  %s301_s1, 256, %s25_s20, [#allocation3]  }
  0x19   :  { %201 = dma.done.wait [#allocation5], 16  }
  0x1a   :  { %202 = vsyncadd [#allocation5], 4294967280 }
  0x1b   :  { %203 = dma.done.wait [#allocation3], 256  }
  0x1c   :  { %204 = vsyncadd [#allocation3], 4294967040 }
  0x1d   :  { %34 = sfence }
  0x1e   :  { %s37_s30 = sld [smem:[#allocation2]]  ;;  %s249_s3 = sld [smem:[#allocation2 + $0x1]]  ;;  %v35_v0 = vld [vmem:[#allocation6] sm:$0xff]  ;;  %v36_v1 = vld [vmem:[#allocation6 + $0x8] sm:$0xff] }
  0x1f   :  { %s130_s4 = sld [smem:[#allocation2 + $0x6]]  ;;  %s251_s5 = sld [smem:[#allocation2 + $0xb]] }
  0x20   :  { %s253_s6 = sld [smem:[#allocation2 + $0x2]]  ;;  %s133_s7 = sld [smem:[#allocation2 + $0x7]] }
  0x21   :  { %s255_s8 = sld [smem:[#allocation2 + $0xc]]  ;;  %s257_s9 = sld [smem:[#allocation2 + $0x3]] }
  0x22   :  { %s259_s1 = sld [smem:[#allocation2 + $0x8]]  ;;  %s261_s10 = sld [smem:[#allocation2 + $0xd]] }
  0x23   :  { %s263_s11 = sld [smem:[#allocation2 + $0x4]]  ;;  %s265_s12 = sld [smem:[#allocation2 + $0x9]] }
  0x24   :  { %v38_v2 = vstv %s37_s30  ;;  %v50_v3 = vstv %s249_s3  ;;  %s268_s13 = sld [smem:[#allocation2 + $0xe]]  ;;  %s270_s14 = sld [smem:[#allocation2 + $0x5]] }
  0x25   :  { %v39_v4 = vmul.f32 %v38_v2, %v35_v0  ;;  %v44_v5 = vstv %s130_s4  ;;  %v47_v6 = vstv %s251_s5  ;;  %s273_s15 = sld [smem:[#allocation2 + $0xa]]  ;;  %s275_s16 = sld [smem:[#allocation2 + $0xf]]  ;;  %v40_v7 = vmul.f32 %v38_v2, %v36_v1 }
  0x26   :  { %v45_v8 = vmax.f32 %v35_v0, %v44_v5  ;;  %v58_v9 = vstv %s133_s7  ;;  %v64_v10 = vstv %s253_s6  ;;  %v46_v11 = vmax.f32 %v36_v1, %v44_v5  ;;  %s209_s17 = smov [#allocation7]  }
  0x27   :  { %v59_v12 = vmax.f32 %v35_v0, %v58_v9  ;;  %v61_v13 = vstv %s255_s8  ;;  %v78_v14 = vstv %s257_s9  ;;  %v60_v15 = vmax.f32 %v36_v1, %v58_v9  ;;  %s119_s18 = sshll.u32 %s209_s17, 4  ;;  %s120_s18 = int_to_ptr.vmem [resolvable:$true] %s119_s18 }
  0x28   :  { %v48_v16 = vmin.f32 %v45_v8, %v47_v6  ;;  %v72_v17 = vstv %s259_s1  ;;  %v75_v18 = vstv %s261_s10  ;;  %v49_v19 = vmin.f32 %v46_v11, %v47_v6  ;;  %s179_s19 = scalar_lea.vmem %s120_s18, 256  ;;  %p184_p12 = scmp.lt.s32.totalorder %s120_s18, %s120_s18 }
  0x29   :  { %v62_v20 = vmin.f32 %v59_v12, %v61_v13  ;;  %v73_v21 = vmax.f32 %v35_v0, %v72_v17  ;;  %v86_v22 = vstv %s265_s12  ;;  %v92_v23 = vstv %s263_s11  ;;  %p180_p11 = scmp.ne.s32.totalorder %s120_s18, %s179_s19  ;;  %p185_p13 = scmp.lt.s32.totalorder %s179_s19, %s179_s19 }
  0x2a   :  { %v51_v24 = vmul.f32 %v50_v3, %v48_v16  ;;  %v87_v25 = vmax.f32 %v35_v0, %v86_v22  ;;  %v89_v26 = vstv %s268_s13  ;;  %v106_v27 = vstv %s270_s14 }
  0x2b   :  { %v65_v28 = vmul.f32 %v64_v10, %v62_v20  ;;  %v76_v29 = vmin.f32 %v73_v21, %v75_v18  ;;  %v100_v30 = vstv %s273_s15  ;;  %v103_v31 = vstv %s275_s16  ;;  %p186_p0 = por %p185_p13, %p184_p12 }
  0x2c   :  { %v53_v32 = vsub.f32 %v39_v4, %v51_v24  ;;  %v90_v33 = vmin.f32 %v87_v25, %v89_v26  ;;  %v101_v34 = vmax.f32 %v35_v0, %v100_v30  ;;  %v52_v35 = vmul.f32 %v50_v3, %v49_v19 }
  0x2d   :  { %v79_v36 = vmul.f32 %v78_v14, %v76_v29  ;;  %v63_v37 = vmin.f32 %v60_v15, %v61_v13  ;;  %v74_v38 = vmax.f32 %v36_v1, %v72_v17  ;;  %v88_v39 = vmax.f32 %v36_v1, %v86_v22  ;;  %p187_p1 = pnand %p186_p0, %p180_p11 }
  0x2e   :  { %v67_v40 = vsub.f32 %v53_v32, %v65_v28  ;;  %v93_v41 = vmul.f32 %v92_v23, %v90_v33  ;;  %v104_v42 = vmin.f32 %v101_v34, %v103_v31  ;;  %v54_v43 = vsub.f32 %v40_v7, %v52_v35 }
  0x2f   :  { %v66_v44 = vmul.f32 %v64_v10, %v63_v37  ;;  %v77_v45 = vmin.f32 %v74_v38, %v75_v18  ;;  %v91_v46 = vmin.f32 %v88_v39, %v89_v26  ;;  %v102_v47 = vmax.f32 %v36_v1, %v100_v30 }
  0x30   :  { %v81_v48 = vsub.f32 %v67_v40, %v79_v36  ;;  %v107_v49 = vmul.f32 %v106_v27, %v104_v42 }
  0x31   :  { %v68_v50 = vsub.f32 %v54_v43, %v66_v44  ;;  %v80_v51 = vmul.f32 %v78_v14, %v77_v45  ;;  %v94_v52 = vmul.f32 %v92_v23, %v91_v46  ;;  %v105_v53 = vmin.f32 %v102_v47, %v103_v31 }
  0x32   :  { %v95_v54 = vsub.f32 %v81_v48, %v93_v41 }
  0x33   :  { %v82_v55 = vsub.f32 %v68_v50, %v80_v51  ;;  %v108_v56 = vmul.f32 %v106_v27, %v105_v53 }
  0x34   :  { %v109_v57 = vsub.f32 %v95_v54, %v107_v49 }
  0x35   :  { %v96_v58 = vsub.f32 %v82_v55, %v94_v52 }
  0x36   :  { %111 = vst [vmem:[#allocation7] sm:$0xff] %v109_v57 }
  0x37   :  { %v110_v59 = vsub.f32 %v96_v58, %v108_v56 }
  0x39   :  { %112 = vst [vmem:[#allocation7 + $0x8] sm:$0xff] %v110_v59 }
  0x3a   :  { %190 = shalt.err (!%p187_p1)
}
  0x3b   :  { %s191_s22 = scalar_lea.hbm %s302_s2, 256 }
  0x3c   :  { %p192_p2 = scmp.ne.s32.totalorder %s302_s2, %s191_s22  ;;  %p195_p3 = scmp.lt.u32.totalorder %s191_s22, %s302_s2 }
  0x3e   :  { %p197_p4 = pnand %p195_p3, %p192_p2 }
  0x40   :  { %200 = shalt.err (!%p197_p4)
}
  0x41   :  { %122 = dma.vmem_to_hbm [thread:$0]  %s120_s18, 256, %s302_s2, [#allocation4]  }
  0x42   :  { %205 = dma.done.wait [#allocation4], 256  }
  0x43   :  { %206 = vsyncadd [#allocation4], 4294967040 }
  0x44   :  { %126 = vsyncpa [#allocation3], 1 }
  0x45   :  { %127 = vsyncpa [#allocation4], 1 }
  0x46   :  { %128 = vsyncpa [#allocation5], 1 }

</bundles_post_ra>
